<compile_context>
chip_gen: v7x
topology: tpu7x:2x2x1
jax: 0.10.0
libtpu: 0.0.40
codegen_flags: <defaults>
</compile_context>

<pallas_src>
import functools
import math

import jax
import jax.numpy as jnp
from jax.experimental import pallas as pl
from jax.experimental.pallas import tpu as pltpu


def _round_up(x, m):
    return ((x + m - 1) // m) * m


def _proj_kernel(x_ref, w_ref, b_ref, o_ref, acc_ref):
    # x_ref: (tm, tk) bf16   w_ref: (tk, tn) bf16   b_ref: (1, tn) f32
    # o_ref: (tm, tn) f32    acc_ref: (tm, tn) f32 scratch
    k = pl.program_id(2)

    @pl.when(k == 0)
    def _():
        acc_ref[...] = jnp.zeros_like(acc_ref)

    acc_ref[...] += jnp.dot(
        x_ref[...], w_ref[...], preferred_element_type=jnp.float32
    )

    @pl.when(k == pl.num_programs(2) - 1)
    def _():
        # Minimal lane-dense epilogue: one add + cast per output tile.
        o_ref[...] = (acc_ref[...] + b_ref[...]).astype(o_ref.dtype)


def patch_projection(flat, w_kn, bias, out_dtype=jnp.float32):
    """flat: (M, K), w_kn: (K, N), bias: (N,) -> (M, N) in out_dtype."""
    M, K = flat.shape
    N = w_kn.shape[1]

    # bf16 inputs for the MXU; f32 accumulation inside the kernel.
    x_b = flat.astype(jnp.bfloat16)
    w_b = w_kn.astype(jnp.bfloat16)
    b_f = bias.astype(jnp.float32)

    # MXU/lane-friendly tiles: N, K tiles are multiples of 128; M tile of 8.
    # Caps keep double-buffered tiles + resident weight + f32 acc well inside
    # every generation's scoped VMEM budget (incl. v7x's 64 MiB physical).
    tn = min(512, _round_up(N, 128))
    tk = min(1024, _round_up(K, 128))
    tm = min(512, _round_up(M, 8))
    Mp = _round_up(M, tm)
    Np = _round_up(N, tn)
    Kp = _round_up(K, tk)

    if (Mp, Kp) != (M, K):
        x_b = jnp.pad(x_b, ((0, Mp - M), (0, Kp - K)))
    if (Kp, Np) != (K, N):
        w_b = jnp.pad(w_b, ((0, Kp - K), (0, Np - N)))
    if Np != N:
        b_f = jnp.pad(b_f, (0, Np - N))
    b2 = b_f.reshape(1, Np)

    grid = (Mp // tm, Np // tn, Kp // tk)

    out = pl.pallas_call(
        _proj_kernel,
        out_shape=jax.ShapeDtypeStruct((Mp, Np), out_dtype),
        grid_spec=pltpu.PrefetchScalarGridSpec(
            num_scalar_prefetch=0,
            grid=grid,
            in_specs=[
                # Activation tiles stream with (i, k).
                pl.BlockSpec((tm, tk), lambda i, j, k: (i, k)),
                # Weight ignores the M grid index; for typical patch-embed
                # shapes (single (tk, tn) tile) it stays VMEM-resident.
                pl.BlockSpec((tk, tn), lambda i, j, k: (k, j)),
                # Bias: one (1, tn) lane-dense block per N tile.
                pl.BlockSpec((1, tn), lambda i, j, k: (0, j)),
            ],
            out_specs=pl.BlockSpec((tm, tn), lambda i, j, k: (i, j)),
            scratch_shapes=[pltpu.VMEM((tm, tn), jnp.float32)],
        ),
        compiler_params=pltpu.CompilerParams(
            dimension_semantics=("parallel", "parallel", "arbitrary"),
        ),
    )(x_b, w_b, b2)

    if (Mp, Np) != (M, N):
        out = out[:M, :N]
    return out


def patchify(x, patch_size):
    """x: (B, C, H, W) -> (B, num_patches, C*P*P), matching torch unfold order."""
    B, C, H, W = x.shape
    P = patch_size
    x = x.reshape(B, C, H // P, P, W // P, P)
    # Same ordering as torch unfold+permute(0,2,3,1,4,5): (B, H/P, W/P, C, P, P)
    x = jnp.transpose(x, (0, 2, 4, 1, 3, 5))
    return x.reshape(B, (H // P) * (W // P), C * P * P)


@functools.partial(jax.jit, static_argnames=("patch_size",))
def patch_embedding(x, w_kn, bias, patch_size):
    """Full forward: (B, C, H, W) -> (B, num_patches, projection_dim) in f32."""
    B, C, H, W = x.shape
    P = patch_size
    NP = (H // P) * (W // P)
    K = C * P * P
    N = w_kn.shape[1]
    # Cast to bf16 before the patchify shuffle so its extra HBM pass moves
    # half the bytes.
    # TODO(synk): fuse the patchify regroup into the kernel (grid over (B, H//P)
    # strips with an XLU transpose in VMEM) to drop this extra HBM round-trip.
    patches = patchify(x.astype(jnp.bfloat16), P)   # (B, NP, K) bf16
    flat = patches.reshape(B * NP, K)
    out = patch_projection(flat, w_kn, bias)        # Pallas hot path, f32 out
    return out.reshape(B, NP, N)


if __name__ == "__main__":
    # Small shapes: img_size=16, patch_size=4, in_channels=4, projection_dim=32
    B, C, IMG, P, PROJ = 2, 4, 16, 4, 32
    patch_dim = C * P * P          # 64
    num_patches = (IMG // P) ** 2  # 16

    key = jax.random.PRNGKey(0)
    kx, kw, kb = jax.random.split(key, 3)

    x = jax.random.normal(kx, (B, C, IMG, IMG), dtype=jnp.float32)

    # Deterministic param init mimicking nn.Linear default (uniform +-1/sqrt(fan_in)).
    bound = 1.0 / math.sqrt(patch_dim)
    w_nk = jax.random.uniform(kw, (PROJ, patch_dim), minval=-bound, maxval=bound,
                              dtype=jnp.float32)   # PyTorch layout (out, in)
    bias = jax.random.uniform(kb, (PROJ,), minval=-bound, maxval=bound,
                              dtype=jnp.float32)
    w_kn = w_nk.T                                   # kernel layout (in, out)

    out = patch_embedding(x, w_kn, bias, P)
    jax.block_until_ready(out)

    # Reference check in plain f32 JAX (module semantics); bf16 matmul inside
    # the kernel -> modest tolerance.
    ref = patchify(x, P) @ w_kn + bias
    assert out.shape == (B, num_patches, PROJ), out.shape
    assert jnp.allclose(out, ref, atol=5e-2, rtol=5e-2), float(
        jnp.max(jnp.abs(out - ref))
    )

    print("KERNEL_OK")
</pallas_src>

<mosaic_0001>
module attributes {stable_mosaic.version = 11 : i64} {
  func.func @_proj_kernel(%arg0: i32, %arg1: i32, %arg2: i32, %arg3: memref<32x128xbf16, #tpu.memory_space<vmem>>, %arg4: memref<128x128xbf16, #tpu.memory_space<vmem>>, %arg5: memref<1x128xf32, #tpu.memory_space<vmem>>, %arg6: memref<32x128xf32, #tpu.memory_space<vmem>>, %arg7: memref<32x128xf32, #tpu.memory_space<vmem>>) attributes {dimension_semantics = [#tpu.dimension_semantics<parallel>, #tpu.dimension_semantics<parallel>, #tpu.dimension_semantics<arbitrary>], iteration_bounds = array<i64: 1, 1, 1>, scalar_prefetch = 0 : i64, scratch_operands = 1 : i64, tpu.core_type = #tpu.core_type<tc>, window_params = [{transform_indices = @transform_0, window_bounds = array<i64: 32, 128>}, {transform_indices = @transform_1, window_bounds = array<i64: 128, 128>}, {transform_indices = @transform_2, window_bounds = array<i64: 1, 128>}, {transform_indices = @transform_3, window_bounds = array<i64: 32, 128>}]} {
    %c0_i32 = arith.constant 0 : i32
    %0 = arith.cmpi eq, %arg2, %c0_i32 : i32
    %1 = arith.extui %0 : i1 to i32
    %c0_i32_0 = arith.constant 0 : i32
    %2 = arith.cmpi ne, %1, %c0_i32_0 : i32
    scf.if %2 {
      %cst_10 = arith.constant 0.000000e+00 : f32
      %12 = vector.broadcast %cst_10 : f32 to vector<32x128xf32>
      %c0_11 = arith.constant 0 : index
      %c0_12 = arith.constant 0 : index
      %13 = vector.load %arg7[%c0_11, %c0_12] : memref<32x128xf32, #tpu.memory_space<vmem>>, vector<32x128xf32>
      tpu.vector_store %arg7[%c0_11, %c0_12], %12 {strides = array<i32>} : memref<32x128xf32, #tpu.memory_space<vmem>>, vector<32x128xf32>,
    } else {
    }
    %c0 = arith.constant 0 : index
    %c0_1 = arith.constant 0 : index
    %3 = vector.load %arg7[%c0, %c0_1] : memref<32x128xf32, #tpu.memory_space<vmem>>, vector<32x128xf32>
    %c0_2 = arith.constant 0 : index
    %c0_3 = arith.constant 0 : index
    %4 = vector.load %arg3[%c0_2, %c0_3] : memref<32x128xbf16, #tpu.memory_space<vmem>>, vector<32x128xbf16>
    %c0_4 = arith.constant 0 : index
    %c0_5 = arith.constant 0 : index
    %5 = vector.load %arg4[%c0_4, %c0_5] : memref<128x128xbf16, #tpu.memory_space<vmem>>, vector<128x128xbf16>
    %cst = arith.constant dense<0.000000e+00> : vector<32x128xf32>
    %6 = tpu.matmul %4, %5, %cst {dimension_numbers = #tpu.dot_dimension_numbers<[1], [0], [0], [1], [0, 0, 1, 1], [], []>} : vector<32x128xbf16>, vector<128x128xbf16>, vector<32x128xf32> -> vector<32x128xf32>
    %7 = arith.addf %3, %6 : vector<32x128xf32>
    %c0_6 = arith.constant 0 : index
    %c0_7 = arith.constant 0 : index
    %8 = vector.load %arg7[%c0_6, %c0_7] : memref<32x128xf32, #tpu.memory_space<vmem>>, vector<32x128xf32>
    tpu.vector_store %arg7[%c0_6, %c0_7], %7 {strides = array<i32>} : memref<32x128xf32, #tpu.memory_space<vmem>>, vector<32x128xf32>,
    %c0_i32_8 = arith.constant 0 : i32
    %9 = arith.cmpi eq, %arg2, %c0_i32_8 : i32
    %10 = arith.extui %9 : i1 to i32
    %c0_i32_9 = arith.constant 0 : i32
    %11 = arith.cmpi ne, %10, %c0_i32_9 : i32
    scf.if %11 {
      %c0_10 = arith.constant 0 : index
      %c0_11 = arith.constant 0 : index
      %12 = vector.load %arg7[%c0_10, %c0_11] : memref<32x128xf32, #tpu.memory_space<vmem>>, vector<32x128xf32>
      %c0_12 = arith.constant 0 : index
      %c0_13 = arith.constant 0 : index
      %13 = vector.load %arg5[%c0_12, %c0_13] : memref<1x128xf32, #tpu.memory_space<vmem>>, vector<1x128xf32>
      %14 = vector.broadcast %13 : vector<1x128xf32> to vector<32x128xf32>
      %15 = arith.addf %12, %14 : vector<32x128xf32>
      %c0_14 = arith.constant 0 : index
      %c0_15 = arith.constant 0 : index
      %16 = vector.load %arg6[%c0_14, %c0_15] : memref<32x128xf32, #tpu.memory_space<vmem>>, vector<32x128xf32>
      tpu.vector_store %arg6[%c0_14, %c0_15], %15 {strides = array<i32>} : memref<32x128xf32, #tpu.memory_space<vmem>>, vector<32x128xf32>,
    } else {
    }
    return
  }
  func.func @transform_0(%arg0: i32, %arg1: i32, %arg2: i32) -> (i32, i32) {
    %c0_i32 = arith.constant 0 : i32
    return %arg0, %arg2 : i32, i32
  }
  func.func @transform_1(%arg0: i32, %arg1: i32, %arg2: i32) -> (i32, i32) {
    %c0_i32 = arith.constant 0 : i32
    return %arg2, %arg1 : i32, i32
  }
  func.func @transform_2(%arg0: i32, %arg1: i32, %arg2: i32) -> (i32, i32) {
    %c0_i32 = arith.constant 0 : i32
    %c0_i32_0 = arith.constant 0 : i32
    return %c0_i32, %arg1 : i32, i32
  }
  func.func @transform_3(%arg0: i32, %arg1: i32, %arg2: i32) -> (i32, i32) {
    %c0_i32 = arith.constant 0 : i32
    return %arg0, %arg1 : i32, i32
  }
}

</mosaic_0001>

<bundles_post_ra>
// kernel: patch_embedding.1
= control target key start
LH: loop header
LB: loop body
LE: loop exit
PB: predicated region body
PF: predicated region fallthrough
CT: control target
= control target key end

     0   :  { %s349_s0 = inlined_call_operand.vmem [shape: bf16[32,128], index: 0, kind: input, shape index: {}]   ;;  %s350_s1 = inlined_call_operand.vmem [shape: bf16[128,128], index: 1, kind: input, shape index: {}]   ;;  %s351_s2 = inlined_call_operand.vmem [shape: f32[1,128], index: 2, kind: input, shape index: {}]   ;;  %s352_s3 = inlined_call_operand.hbm [shape: f32[32,128], index: 3, kind: output, shape index: {}]  }
   0x1   :  { %v247_v0 = vld [vmem:[%s350_s1] sm:$0xff]   ;;  %v248_v1 = vld [vmem:[%s350_s1 + $0x8] sm:$0xff]   ;;  %v249_v2 = vld [vmem:[%s350_s1 + $0x10] sm:$0xff]  }
   0x2   :  { %224 = vmatprep.subr.bf16.mxu0 %v247_v0  ;;  %v250_v3 = vld [vmem:[%s350_s1 + $0x18] sm:$0xff]   ;;  %v255_v4 = vld [vmem:[%s349_s0] sm:$0xff]  }
   0x3   :  { %225 = vmatpush3.bf16.msra.mxu0 %v247_v0  ;;  %240 = vmatprep.mubr.bf16.mxu0 %v255_v4 }
   0x4   :  { %226 = vmatprep.subr.bf16.mxu0 %v248_v1 }
   0x7   :  { %227 = vmatpush3.bf16.msra.mxu0 %v248_v1 }
   0x8   :  { %228 = vmatprep.subr.bf16.mxu0 %v249_v2 }
   0x9   :  { %8 = vsyncpa [#allocation4], 0  ;;  %v251_v5 = vld [vmem:[%s350_s1 + $0x20] sm:$0xff]   ;;  %v252_v6 = vld [vmem:[%s350_s1 + $0x28] sm:$0xff]   ;;  %s281_s7 = smov [#allocation3]  }
   0xa   :  { %v253_v7 = vld [vmem:[%s350_s1 + $0x30] sm:$0xff]   ;;  %v254_v8 = vld [vmem:[%s350_s1 + $0x38] sm:$0xff]   ;;  %v256_v9 = vld [vmem:[%s349_s0 + $0x8] sm:$0xff]   ;;  %s192_s8 = sshll.u32 %s281_s7, 4  ;;  %s193_s8 = int_to_ptr.vmem [resolvable:$true] %s192_s8 }
   0xb   :  { %229 = vmatpush3.bf16.msra.mxu0 %v249_v2  ;;  %v213_v10 = vld [vmem:[%s351_s2] ss:$0 sm:$0xff]  ;;  %s257_s0 = scalar_lea.vmem %s193_s8, 512  ;;  %p262_p1 = scmp.lt.s32.totalorder %s193_s8, %s193_s8 }
   0xc   :  { %230 = vmatprep.subr.bf16.mxu0 %v250_v3  ;;  %p258_p0 = scmp.ne.s32.totalorder %s193_s8, %s257_s0  ;;  %p263_p2 = scmp.lt.s32.totalorder %s257_s0, %s257_s0 }
   0xe   :  { %p264_p3 = por %p263_p2, %p262_p1 }
   0xf   :  { %231 = vmatpush3.bf16.msra.mxu0 %v250_v3 }
  0x10   :  { %232 = vmatprep.subr.bf16.mxu0 %v251_v5  ;;  %p265_p4 = pnand %p264_p3, %p258_p0 }
  0x13   :  { %233 = vmatpush3.bf16.msra.mxu0 %v251_v5 }
  0x14   :  { %234 = vmatprep.subr.bf16.mxu0 %v252_v6 }
  0x17   :  { %235 = vmatpush3.bf16.msra.mxu0 %v252_v6 }
  0x18   :  { %236 = vmatprep.subr.bf16.mxu0 %v253_v7 }
  0x1b   :  { %237 = vmatpush3.bf16.msra.mxu0 %v253_v7 }
  0x1c   :  { %238 = vmatprep.subr.bf16.mxu0 %v254_v8 }
  0x1f   :  { %239 = vmatpush3.bf16.msra.mxu0 %v254_v8 }
  0x22   :  { %241 = vmatmul.mubr.bf16.vlgmr.msra.gmra.mrb[0].mxu0 %v256_v9 }
  0xf5   :  { %v242_v11 = vpop.f32.mrb[0].mxu0 }
  0xf6   :  { %v181_v12 = vadd.f32 %v242_v11, %v213_v10  ;;  %v142_v13 = vpop.f32.mrb[1].mxu0 }
  0xf7   :  { %v179_v14 = vadd.f32 %v213_v10, %v142_v13  ;;  %v243_v15 = vpop.f32.mrb[2].mxu0 }
  0xf8   :  { %185 = vst [vmem:[#allocation3 + $0x10] sm:$0xff] %v181_v12  ;;  %v182_v16 = vadd.f32 %v243_v15, %v213_v10  ;;  %v145_v17 = vpop.f32.mrb[3].mxu0 }
  0xf9   :  { %183 = vst [vmem:[#allocation3] sm:$0xff] %v179_v14  ;;  %v180_v18 = vadd.f32 %v213_v10, %v145_v17 }
  0xfa   :  { %186 = vst [vmem:[#allocation3 + $0x18] sm:$0xff] %v182_v16 }
  0xfb   :  { %184 = vst [vmem:[#allocation3 + $0x8] sm:$0xff] %v180_v18 }
  0xfc   :  { %268 = shalt.err (!%p265_p4)
}
  0xfd   :  { %s269_s9 = scalar_lea.hbm %s352_s3, 512 }
  0xfe   :  { %p270_p5 = scmp.ne.s32.totalorder %s352_s3, %s269_s9  ;;  %p273_p6 = scmp.lt.u32.totalorder %s269_s9, %s352_s3 }
 0x100   :  { %p275_p7 = pnand %p273_p6, %p270_p5 }
 0x102   :  { %278 = shalt.err (!%p275_p7)
}
 0x103   :  { %s282_s14 = smov 128   ;;  %s283_s15 = smov 8  }
 0x104   :  { %198 = dma.vmem_to_hbm [thread:$0]  %s193_s8, 512, %s352_s3, [#allocation4], %s282_s14, %s282_s14, %s283_s15  }
 0x105   :  { %279 = dma.done.wait [#allocation4], 512  }
 0x106   :  { %280 = vsyncadd [#allocation4], 4294966784 }
 0x107   :  { %202 = vsyncpa [#allocation4], 1 }

</bundles_post_ra>
